<compile_context>
chip_gen: v7x
topology: tpu7x:2x2x1
jax: 0.10.0
libtpu: 0.0.40
codegen_flags: <defaults>
</compile_context>

<pallas_src>
import functools

import numpy as np
import jax
import jax.numpy as jnp
from jax import lax
from jax.experimental import pallas as pl
from jax.experimental.pallas import tpu as pltpu


def make_kernel_np(k):
    """Numpy replica of the PyTorch make_kernel()."""
    k = np.asarray(k, dtype=np.float32)
    if k.ndim == 1:
        k = k[None, :] * k[:, None]
    k = k / k.sum()
    return k


# ---------------------------------------------------------------------------
# pltpu.roll sign-convention probe (runs once on device, tiny, cached).
# ---------------------------------------------------------------------------
def _roll_probe_kernel(x_ref, o_ref):
    o_ref[...] = pltpu.roll(x_ref[...], 1, axis=0)


@functools.lru_cache(maxsize=None)
def _roll_shift_sign():
    """Returns s so that pltpu.roll(y, (s*d) % n, axis=0)[k] == y[(k+d) % n]."""
    x = jnp.broadcast_to(jnp.arange(8, dtype=jnp.float32)[:, None], (8, 128))
    out = pl.pallas_call(
        _roll_probe_kernel,
        out_shape=jax.ShapeDtypeStruct((8, 128), jnp.float32),
    )(x)
    # numpy convention: roll(x, +1, axis=0)[1] == x[0] (== 0 here)
    return -1 if float(np.asarray(out)[1, 0]) == 0.0 else 1


# ---------------------------------------------------------------------------
# Main kernel: one block of TB channels, flattened as (TB*H, W).
# ---------------------------------------------------------------------------
def _upsample_kernel(x_ref, u_ref, w_ref, o_ref, *, phase_shifts, upw, roll_sign):
    """
    x_ref : (TB*H, W)        input rows (channel-major, row-minor)
    u_ref : (W, up*W)        banded horizontal upfirdn matrix
    w_ref : (T, TB*H, 1)     per-term vertical tap weights (0 across channel edges)
    o_ref : (TB*H, up*up*W)  row k holds the `up` output rows of input row k;
                             phase py lives in columns [py*up*W, (py+1)*up*W)
    """
    x = x_ref[...].astype(jnp.float32)
    # Horizontal pass on the (otherwise idle) MXU.  Zero-insertion, padding,
    # FIR taps and the output-column interleave are all baked into `u`.
    y = jnp.dot(x, u_ref[...], preferred_element_type=jnp.float32)  # (TB*H, up*W)

    nrows = y.shape[0]
    t = 0
    for py, shifts in enumerate(phase_shifts):
        acc = None
        for d in shifts:
            yd = y if d == 0 else pltpu.roll(y, (roll_sign * d) % nrows, axis=0)
            term = w_ref[t] * yd                      # (TB*H,1) * (TB*H,up*W)
            acc = term if acc is None else acc + term
            t += 1
        o_ref[:, py * upw:(py + 1) * upw] = acc.astype(o_ref.dtype)


def _pick_block_channels(b, h, w, up):
    """Channels per grid step: large enough to amortize per-step overhead and
    give the DMA engine big transfers, small enough that double-buffered
    in/out blocks + intermediates stay well inside VMEM (v7x: 64 MiB)."""
    per_ch = h * w * 4 * (2 + 2 * up * up + 3 * up)   # rough f32 VMEM need / channel
    budget = 24 * 1024 * 1024
    tb = int(max(1, min(b, budget // max(per_ch, 1))))
    if b >= 2:                    # keep >=2 grid steps so both v7x cores get work
        tb = min(tb, max(1, b // 2))
    while tb > 1 and (b % tb != 0 or (tb * h) % 8 != 0):
        tb -= 1
    if (tb * h) % 8 != 0 and tb != b:
        tb = b                    # whole-array block: always a legal BlockSpec
    # TODO(synk): for very large spatial extents (tb==1 still over budget) add a
    # row-band grid axis with a (taps-1)-row halo.
    return tb


class Upsample:
    """JAX/Pallas equivalent of the PyTorch Upsample module (up=factor, down=1)."""

    def __init__(self, kernel, factor=2):
        self.factor = int(factor)
        k1 = np.asarray(kernel, dtype=np.float32)
        if k1.ndim != 1:
            # TODO(synk): non-separable 2-D blur kernels would need a dense polyphase path.
            raise NotImplementedError("Upsample: only 1-D (separable) blur kernels supported")
        self.kernel2d = make_kernel_np(k1) * (self.factor ** 2)  # matches torch buffer
        self.k1d = k1 / k1.sum() * self.factor                   # kernel2d == outer(k1d, k1d)
        p = self.kernel2d.shape[0] - self.factor
        self.pad = ((p + 1) // 2 + self.factor - 1, p // 2)

    def __call__(self, x):
        n, c, h, w = x.shape
        up = self.factor
        pad0, pad1 = self.pad
        kt = self.k1d.shape[0]
        assert pad0 >= 0 and pad1 >= 0        # cropping configs unsupported
        assert pad0 + pad1 == kt - 1          # => output is exactly (up*h, up*w)
        out_h, out_w = up * h, up * w

        b = n * c
        tb = _pick_block_channels(b, h, w, up)
        nblk = b // tb

        wf = self.k1d[::-1].copy()            # flipped 1-D taps (true convolution)

        # Horizontal upfirdn as a banded (w, up*w) matrix: out[x] = sum_j U[j,x]*in[j]
        jj, xx = np.meshgrid(np.arange(w), np.arange(out_w), indexing="ij")
        kk = up * jj + pad0 - xx
        u = np.where((kk >= 0) & (kk < kt), wf[np.clip(kk, 0, kt - 1)], 0.0)
        u = u.astype(np.float32)

        # Vertical polyphase taps: output row up*yo+py uses input row yo+d with
        # coefficient wf[up*d + pad0 - py].
        phase_shifts = []
        coeffs = []
        for py in range(up):
            ds = []
            for d in range(-kt, kt + 1):
                idx = up * d + pad0 - py
                if 0 <= idx < kt:
                    ds.append(d)
                    coeffs.append((d, float(wf[idx])))
            assert ds
            phase_shifts.append(tuple(ds))
        assert max(abs(d) for ds in phase_shifts for d in ds) < h

        # Per-row weights: tap coefficient, zeroed where the tap would cross a
        # channel boundary (this also neutralizes the circular roll wrap).
        rows = np.arange(tb * h) % h
        wrow = np.stack(
            [np.where((rows + d >= 0) & (rows + d < h), cval, 0.0)
             for d, cval in coeffs],
            axis=0,
        ).astype(np.float32)[:, :, None]                 # (T, tb*h, 1)
        nterms = wrow.shape[0]

        x2 = x.reshape(b * h, w)                         # free reshape (NCHW row-major)

        kern = functools.partial(
            _upsample_kernel,
            phase_shifts=tuple(phase_shifts),
            upw=out_w,
            roll_sign=_roll_shift_sign(),
        )

        flops = 2 * b * h * w * out_w + 2 * nterms * b * h * out_w
        bytes_accessed = (
            x2.size * x2.dtype.itemsize
            + u.size * 4 + wrow.size * 4
            + b * out_h * out_w * x.dtype.itemsize
        )

        out2 = pl.pallas_call(
            kern,
            out_shape=jax.ShapeDtypeStruct((b * h, up * out_w), x.dtype),
            grid=(nblk,),
            in_specs=[
                pl.BlockSpec((tb * h, w), lambda i: (i, 0)),
                pl.BlockSpec((w, out_w), lambda i: (0, 0)),
                pl.BlockSpec((nterms, tb * h, 1), lambda i: (0, 0, 0)),
            ],
            out_specs=pl.BlockSpec((tb * h, up * out_w), lambda i: (i, 0)),
            compiler_params=pltpu.CompilerParams(
                dimension_semantics=("parallel",)),
            cost_estimate=pl.CostEstimate(
                flops=int(flops), transcendentals=0,
                bytes_accessed=int(bytes_accessed)),
        )(x2, jnp.asarray(u), jnp.asarray(wrow))

        # (b*h, up*up*w) -> (n, c, up*h, up*w) is a pure metadata reshape because
        # the `up` output rows belonging to one input row are contiguous in NCHW.
        return out2.reshape(n, c, out_h, out_w)


def _reference(x, up_module):
    """Independent JAX reference using lax.conv (mirrors upfirdn2d_native)."""
    n, c, h, w = x.shape
    up = up_module.factor
    pad0, pad1 = up_module.pad
    b = n * c
    xb = x.reshape(b, 1, h, w).astype(jnp.float32)
    hi = pad1 + (up - 1)
    xp = lax.pad(
        xb, jnp.float32(0.0),
        [(0, 0, 0), (0, 0, 0), (pad0, hi, up - 1), (pad0, hi, up - 1)],
    )
    wf = jnp.asarray(np.flip(up_module.kernel2d, (0, 1)).copy())[None, None]
    out = lax.conv_general_dilated(
        xp, wf, window_strides=(1, 1), padding="VALID",
        dimension_numbers=("NCHW", "OIHW", "NCHW"),
    )
    return out.reshape(n, c, out.shape[2], out.shape[3]).astype(x.dtype)


if __name__ == "__main__":
    key = jax.random.PRNGKey(0)
    N, C, H, W = 2, 4, 16, 16
    x = jax.random.normal(key, (N, C, H, W), dtype=jnp.float32)

    up = Upsample(kernel=[1, 3, 3, 1], factor=2)

    out = jax.block_until_ready(up(x))
    assert out.shape == (N, C, H * 2, W * 2), out.shape

    ref = jax.block_until_ready(_reference(x, up))
    np.testing.assert_allclose(np.asarray(out), np.asarray(ref),
                               rtol=1e-4, atol=1e-5)

    print("KERNEL_OK")
</pallas_src>

<mosaic_0001>
module attributes {stable_mosaic.version = 11 : i64} {
  func.func @_roll_probe_kernel(%arg0: memref<8x128xf32, #tpu.memory_space<vmem>>, %arg1: memref<8x128xf32, #tpu.memory_space<vmem>>) attributes {dimension_semantics = [], scalar_prefetch = 0 : i64, scratch_operands = 0 : i64, tpu.core_type = #tpu.core_type<tc>} {
    %c0 = arith.constant 0 : index
    %c0_0 = arith.constant 0 : index
    %0 = vector.load %arg0[%c0, %c0_0] : memref<8x128xf32, #tpu.memory_space<vmem>>, vector<8x128xf32>
    %c1_i32 = arith.constant 1 : i32
    %1 = tpu.dynamic_rotate %0 by %c1_i32 dim 0 : vector<8x128xf32>, i32 -> vector<8x128xf32>
    %c0_1 = arith.constant 0 : index
    %c0_2 = arith.constant 0 : index
    %2 = vector.load %arg1[%c0_1, %c0_2] : memref<8x128xf32, #tpu.memory_space<vmem>>, vector<8x128xf32>
    tpu.vector_store %arg1[%c0_1, %c0_2], %1 {strides = array<i32>} : memref<8x128xf32, #tpu.memory_space<vmem>>, vector<8x128xf32>,
    return
  }
}

</mosaic_0001>

<bundles_post_ra>
// kernel: tpu_custom_call.1
= control target key start
LH: loop header
LB: loop body
LE: loop exit
PB: predicated region body
PF: predicated region fallthrough
CT: control target
= control target key end

     0   :  { %6 = vsyncpa [#allocation3], 0  ;;  %s125_s0 = inlined_call_operand.hbm [shape: f32[8,128], index: 0, kind: input, shape index: {}]   ;;  %s126_s1 = inlined_call_operand.hbm [shape: f32[8,128], index: 1, kind: output, shape index: {}]  }
   0x1   :  { %7 = vsyncpa [#allocation4], 0  ;;  %s89_s6 = smov [#allocation2]   ;;  %s41_s10 = scalar_lea.hbm %s125_s0, 128 }
   0x2   :  { %s14_s7 = sshll.u32 %s89_s6, 4  ;;  %p42_p0 = scmp.ne.s32.totalorder %s125_s0, %s41_s10  ;;  %s15_s7 = int_to_ptr.vmem [resolvable:$true] %s14_s7 }
   0x3   :  { %p45_p1 = scmp.lt.u32.totalorder %s41_s10, %s125_s0 }
   0x5   :  { %p47_p2 = pnand %p45_p1, %p42_p0 }
   0x7   :  { %50 = shalt.err (!%p47_p2)
}
   0x8   :  { %s51_s15 = scalar_lea.vmem %s15_s7, 128  ;;  %p56_p4 = scmp.lt.s32.totalorder %s15_s7, %s15_s7 }
   0x9   :  { %p52_p3 = scmp.ne.s32.totalorder %s15_s7, %s51_s15  ;;  %p57_p5 = scmp.lt.s32.totalorder %s51_s15, %s51_s15 }
   0xb   :  { %p58_p6 = por %p57_p5, %p56_p4 }
   0xd   :  { %p59_p7 = pnand %p58_p6, %p52_p3 }
   0xf   :  { %62 = shalt.err (!%p59_p7)
}
  0x10   :  { %17 = dma.hbm_to_vmem [thread:$0]  %s125_s0, 128, %s15_s7, [#allocation3]  }
  0x11   :  { %85 = dma.done.wait [#allocation3], 128  }
  0x12   :  { %86 = vsyncadd [#allocation3], 4294967168  ;;  %s90_s18 = smov [#allocation5]   ;;  %v21_v0 = vld [vmem:[#allocation2] sm:$0xff] }
  0x13   :  { %s30_s19 = sshll.u32 %s90_s18, 4  ;;  %v22_v1 = vrot.slane %v21_v0, 7  ;;  %s31_s19 = int_to_ptr.vmem [resolvable:$true] %s30_s19 }
  0x14   :  { %s63_s20 = scalar_lea.vmem %s31_s19, 128  ;;  %p68_p9 = scmp.lt.s32.totalorder %s31_s19, %s31_s19 }
  0x15   :  { %23 = vst [vmem:[#allocation5] sm:$0xff] %v22_v1  ;;  %p64_p8 = scmp.ne.s32.totalorder %s31_s19, %s63_s20  ;;  %p69_p10 = scmp.lt.s32.totalorder %s63_s20, %s63_s20 }
  0x17   :  { %p70_p11 = por %p69_p10, %p68_p9 }
  0x19   :  { %p71_p12 = pnand %p70_p11, %p64_p8 }
  0x1b   :  { %74 = shalt.err (!%p71_p12)
}
  0x1c   :  { %s75_s23 = scalar_lea.hbm %s126_s1, 128 }
  0x1d   :  { %p76_p13 = scmp.ne.s32.totalorder %s126_s1, %s75_s23  ;;  %p79_p0 = scmp.lt.u32.totalorder %s75_s23, %s126_s1 }
  0x1f   :  { %p81_p1 = pnand %p79_p0, %p76_p13 }
  0x21   :  { %84 = shalt.err (!%p81_p1)
}
  0x22   :  { %33 = dma.vmem_to_hbm [thread:$0]  %s31_s19, 128, %s126_s1, [#allocation4]  }
  0x23   :  { %87 = dma.done.wait [#allocation4], 128  }
  0x24   :  { %88 = vsyncadd [#allocation4], 4294967168 }
  0x25   :  { %37 = vsyncpa [#allocation3], 1 }
  0x26   :  { %38 = vsyncpa [#allocation4], 1 }

</bundles_post_ra>
